<compile_context>
chip_gen: v6e
topology: v6e:2x2x1
jax: 0.10.0
libtpu: 0.0.40
codegen_flags: <defaults>
</compile_context>

<pallas_src>
import jax
import jax.numpy as jnp
from jax.experimental import pallas as pl
from jax.experimental.pallas import tpu as pltpu


def _bilinear_attention_kernel(hid_ref, hw_ref, enc_ref, out_ref, m_sc, l_sc):
    # hid_ref: (tb, H)      decoder hidden state block (native dtype)
    # hw_ref:  (tb, H)      hidden @ W, precomputed in f32 (hoisted matmul)
    # enc_ref: (tb, tT, H)  encoder-output block for this T tile
    # out_ref: (tb, H)      attention output block (resident across the T axis)
    # m_sc/l_sc: (tb, 1)    online-softmax running max / running sum-of-exp (f32)
    t = pl.program_id(1)

    @pl.when(t == 0)
    def _():
        m_sc[...] = jnp.full_like(m_sc, -jnp.inf)
        l_sc[...] = jnp.zeros_like(l_sc)

    hw = hw_ref[...]                          # f32 already
    enc = enc_ref[...].astype(jnp.float32)    # (tb, tT, H)

    # score[b, t] = sum_h enc[b, t, h] * hw[b, h]
    # VPU elementwise multiply + XLU lane reduction; keeps the MXU free and hw in f32.
    score = jnp.sum(enc * hw[:, None, :], axis=2)        # (tb, tT) f32

    # Online softmax accumulation over the T grid axis (numerically stable).
    m_prev = m_sc[...]                                    # (tb, 1)
    m_new = jnp.maximum(m_prev, jnp.max(score, axis=1, keepdims=True))
    alpha = jnp.exp(m_prev - m_new)
    l_sc[...] = alpha * l_sc[...] + jnp.sum(jnp.exp(score - m_new), axis=1,
                                            keepdims=True)
    m_sc[...] = m_new

    @pl.when(t == pl.num_programs(1) - 1)
    def _():
        l = l_sc[...]
        # sum_t softmax(score)[b, t] == l / l (mathematically 1).  Keep the
        # division so NaN/Inf in the score propagate exactly like the module.
        scale = l * pl.reciprocal(l, approx=False)        # (tb, 1)
        out_ref[...] = (hid_ref[...].astype(jnp.float32) * scale).astype(out_ref.dtype)


def _pick_tiles(B, T, H, enc_itemsize, budget):
    """Largest (batch_tile, t_tile) whose double-buffered VMEM blocks fit `budget`."""
    # Batch-tile candidates: multiples of 8 dividing B (full dim is the legal
    # fallback); keep >=2 batch grid steps when B allows (v7x megacore sharding).
    cap_b = 512
    if B >= 16:
        cap_b = min(cap_b, B // 2)
    b_cands = sorted([d for d in range(8, min(cap_b, B) + 1, 8) if B % d == 0],
                     reverse=True) or [B]

    # T-tile candidates: whole T (always legal) plus multiples of 8 dividing T.
    t_cands = sorted({T} | {d for d in range(8, min(T, 4096), 8) if T % d == 0},
                     reverse=True)

    def vmem_need(tb, tT):
        return (2 * tb * tT * H * enc_itemsize     # enc blocks, double-buffered
                + tb * tT * H * 4                  # f32 compute temporary
                + 8 * tb * H * 4                   # hid / hw / out blocks (dbl-buffered)
                + (2 << 20))                       # scratch + headroom

    best = None
    for tb in b_cands:
        for tT in t_cands:
            if vmem_need(tb, tT) <= budget:
                key = (tb * tT, tb)                # prefer biggest enc block, then tb
                if best is None or key > best[0]:
                    best = (key, tb, tT)
    if best is None:
        return b_cands[-1], t_cands[-1]
    return best[1], best[2]


def bilinear_attention(hidden, enc_outputs, W):
    """hidden: (B, 1, H), enc_outputs: (B, T, H), W: (H, H) -> (B, H)."""
    B, one, H = hidden.shape
    assert one == 1
    Bt, T, H2 = enc_outputs.shape
    assert Bt == B and H2 == H and W.shape == (H, H)

    h2d = hidden[:, 0, :]                                           # (B, H) glue reshape
    # hidden @ W hoisted to one dense XLA matmul, kept in f32 for the score.
    hw = jnp.dot(h2d, W, preferred_element_type=jnp.float32)        # (B, H) f32

    # Generation-aware VMEM budget: ~75% of physical VMEM
    # (v5e/v6e 128 MiB -> ~96 MiB, v7x 64 MiB -> 48 MiB), capped at 100 MiB.
    try:
        phys_vmem = int(pltpu.get_tpu_info().vmem_capacity_bytes)
    except Exception:
        phys_vmem = 64 << 20
    budget = int(min(max(phys_vmem * 3 // 4, 32 << 20), 100 << 20))

    enc_itemsize = jnp.dtype(enc_outputs.dtype).itemsize
    tb, tT = _pick_tiles(B, T, H, enc_itemsize, budget)
    grid = (B // tb, T // tT)                      # reduction axis (T) last

    cost = pl.CostEstimate(
        flops=2 * B * T * H,
        transcendentals=B * T + B,
        bytes_accessed=B * T * H * enc_itemsize + 3 * B * H * 4,
    )

    return pl.pallas_call(
        _bilinear_attention_kernel,
        out_shape=jax.ShapeDtypeStruct((B, H), hidden.dtype),
        grid_spec=pltpu.PrefetchScalarGridSpec(
            num_scalar_prefetch=0,
            grid=grid,
            in_specs=[
                pl.BlockSpec((tb, H), lambda b, t: (b, 0)),         # hidden block
                pl.BlockSpec((tb, H), lambda b, t: (b, 0)),         # hidden @ W (f32)
                pl.BlockSpec((tb, tT, H), lambda b, t: (b, t, 0)),  # enc_outputs block
            ],
            out_specs=pl.BlockSpec((tb, H), lambda b, t: (b, 0)),
            scratch_shapes=[
                pltpu.VMEM((tb, 1), jnp.float32),   # running max  m
                pltpu.VMEM((tb, 1), jnp.float32),   # running sum  l
            ],
        ),
        compiler_params=pltpu.CompilerParams(
            dimension_semantics=("parallel", "arbitrary"),
            vmem_limit_bytes=budget,
        ),
        cost_estimate=cost,
    )(h2d, hw, enc_outputs)


def _reference(hidden, enc_outputs, W):
    # Pure-JAX replica of the PyTorch forward for verification.
    score = jnp.einsum('boh,hk,btk->bot', hidden, W, enc_outputs)[:, 0, :]   # (B, T)
    attn_w = jax.nn.softmax(score, axis=1)                                   # (B, T)
    T = score.shape[-1]
    hidden_rep = jnp.tile(hidden, (1, T, 1))                                 # (B, T, H)
    return jnp.sum(attn_w[:, :, None] * hidden_rep, axis=1)                  # (B, H)


if __name__ == "__main__":
    # Small but layout-friendly demo shapes: H multiple of 128 (lane-dense
    # stores), batch a multiple of 8 so the grid has >1 batch step, T = 8 like
    # a short encoder sequence.
    B, T, H = 16, 8, 128
    key = jax.random.PRNGKey(0)
    k_w, k_h, k_e = jax.random.split(key, 3)

    # Xavier-uniform init for W (hidden_dim x hidden_dim), deterministic.
    bound = jnp.sqrt(6.0 / (H + H))
    W = jax.random.uniform(k_w, (H, H), jnp.float32, minval=-bound, maxval=bound)

    hidden = jax.random.normal(k_h, (B, 1, H), jnp.float32)
    enc_outputs = jax.random.normal(k_e, (B, T, H), jnp.float32)

    out = bilinear_attention(hidden, enc_outputs, W)
    out = jax.block_until_ready(out)

    ref = _reference(hidden, enc_outputs, W)
    assert out.shape == (B, H)
    assert jnp.allclose(out, ref, atol=1e-4, rtol=1e-4), float(jnp.max(jnp.abs(out - ref)))

    print("KERNEL_OK")
</pallas_src>

<mosaic_0001>
module attributes {stable_mosaic.version = 11 : i64} {
  func.func @_bilinear_attention_kernel(%arg0: i32, %arg1: i32, %arg2: memref<8x128xf32, #tpu.memory_space<vmem>>, %arg3: memref<8x128xf32, #tpu.memory_space<vmem>>, %arg4: memref<8x8x128xf32, #tpu.memory_space<vmem>>, %arg5: memref<8x128xf32, #tpu.memory_space<vmem>>, %arg6: memref<8x1xf32, #tpu.memory_space<vmem>>, %arg7: memref<8x1xf32, #tpu.memory_space<vmem>>) attributes {dimension_semantics = [#tpu.dimension_semantics<parallel>, #tpu.dimension_semantics<arbitrary>], iteration_bounds = array<i64: 2, 1>, scalar_prefetch = 0 : i64, scratch_operands = 2 : i64, tpu.core_type = #tpu.core_type<tc>, window_params = [{transform_indices = @transform_0, window_bounds = array<i64: 8, 128>}, {transform_indices = @transform_1, window_bounds = array<i64: 8, 128>}, {transform_indices = @transform_2, window_bounds = array<i64: 8, 8, 128>}, {transform_indices = @transform_3, window_bounds = array<i64: 8, 128>}]} {
    %c0_i32 = arith.constant 0 : i32
    %0 = arith.cmpi eq, %arg1, %c0_i32 : i32
    %1 = arith.extui %0 : i1 to i32
    %c0_i32_0 = arith.constant 0 : i32
    %2 = arith.cmpi ne, %1, %c0_i32_0 : i32
    scf.if %2 {
      %cst_17 = arith.constant 0xFF800000 : f32
      %28 = vector.broadcast %cst_17 : f32 to vector<8x1xf32>
      %c0_18 = arith.constant 0 : index
      %c0_19 = arith.constant 0 : index
      %29 = vector.load %arg6[%c0_18, %c0_19] : memref<8x1xf32, #tpu.memory_space<vmem>>, vector<8x1xf32>
      tpu.vector_store %arg6[%c0_18, %c0_19], %28 {strides = array<i32>} : memref<8x1xf32, #tpu.memory_space<vmem>>, vector<8x1xf32>,
      %cst_20 = arith.constant 0.000000e+00 : f32
      %30 = vector.broadcast %cst_20 : f32 to vector<8x1xf32>
      %c0_21 = arith.constant 0 : index
      %c0_22 = arith.constant 0 : index
      %31 = vector.load %arg7[%c0_21, %c0_22] : memref<8x1xf32, #tpu.memory_space<vmem>>, vector<8x1xf32>
      tpu.vector_store %arg7[%c0_21, %c0_22], %30 {strides = array<i32>} : memref<8x1xf32, #tpu.memory_space<vmem>>, vector<8x1xf32>,
    } else {
    }
    %c0 = arith.constant 0 : index
    %c0_1 = arith.constant 0 : index
    %3 = vector.load %arg3[%c0, %c0_1] : memref<8x128xf32, #tpu.memory_space<vmem>>, vector<8x128xf32>
    %c0_2 = arith.constant 0 : index
    %c0_3 = arith.constant 0 : index
    %c0_4 = arith.constant 0 : index
    %4 = vector.load %arg4[%c0_2, %c0_3, %c0_4] : memref<8x8x128xf32, #tpu.memory_space<vmem>>, vector<8x8x128xf32>
    %5 = vector.shape_cast %3 : vector<8x128xf32> to vector<8x1x128xf32>
    %6 = vector.broadcast %5 : vector<8x1x128xf32> to vector<8x8x128xf32>
    %7 = arith.mulf %4, %6 : vector<8x8x128xf32>
    %cst = arith.constant dense<0.000000e+00> : vector<8x8xf32>
    %8 = vector.multi_reduction <add>, %7, %cst [2] : vector<8x8x128xf32> to vector<8x8xf32>
    %c0_5 = arith.constant 0 : index
    %c0_6 = arith.constant 0 : index
    %9 = vector.load %arg6[%c0_5, %c0_6] : memref<8x1xf32, #tpu.memory_space<vmem>>, vector<8x1xf32>
    %cst_7 = arith.constant dense<0xFF800000> : vector<8xf32>
    %10 = vector.multi_reduction <maximumf>, %8, %cst_7 [1] : vector<8x8xf32> to vector<8xf32>
    %11 = vector.shape_cast %10 : vector<8xf32> to vector<8x1xf32>
    %12 = arith.maximumf %9, %11 : vector<8x1xf32>
    %13 = arith.subf %9, %12 : vector<8x1xf32>
    %14 = math.exp %13 : vector<8x1xf32>
    %c0_8 = arith.constant 0 : index
    %c0_9 = arith.constant 0 : index
    %15 = vector.load %arg7[%c0_8, %c0_9] : memref<8x1xf32, #tpu.memory_space<vmem>>, vector<8x1xf32>
    %16 = arith.mulf %14, %15 : vector<8x1xf32>
    %17 = vector.broadcast %12 : vector<8x1xf32> to vector<8x8xf32>
    %18 = arith.subf %8, %17 : vector<8x8xf32>
    %19 = math.exp %18 : vector<8x8xf32>
    %cst_10 = arith.constant dense<0.000000e+00> : vector<8xf32>
    %20 = vector.multi_reduction <add>, %19, %cst_10 [1] : vector<8x8xf32> to vector<8xf32>
    %21 = vector.shape_cast %20 : vector<8xf32> to vector<8x1xf32>
    %22 = arith.addf %16, %21 : vector<8x1xf32>
    %c0_11 = arith.constant 0 : index
    %c0_12 = arith.constant 0 : index
    %23 = vector.load %arg7[%c0_11, %c0_12] : memref<8x1xf32, #tpu.memory_space<vmem>>, vector<8x1xf32>
    tpu.vector_store %arg7[%c0_11, %c0_12], %22 {strides = array<i32>} : memref<8x1xf32, #tpu.memory_space<vmem>>, vector<8x1xf32>,
    %c0_13 = arith.constant 0 : index
    %c0_14 = arith.constant 0 : index
    %24 = vector.load %arg6[%c0_13, %c0_14] : memref<8x1xf32, #tpu.memory_space<vmem>>, vector<8x1xf32>
    tpu.vector_store %arg6[%c0_13, %c0_14], %12 {strides = array<i32>} : memref<8x1xf32, #tpu.memory_space<vmem>>, vector<8x1xf32>,
    %c0_i32_15 = arith.constant 0 : i32
    %25 = arith.cmpi eq, %arg1, %c0_i32_15 : i32
    %26 = arith.extui %25 : i1 to i32
    %c0_i32_16 = arith.constant 0 : i32
    %27 = arith.cmpi ne, %26, %c0_i32_16 : i32
    scf.if %27 {
      %c0_17 = arith.constant 0 : index
      %c0_18 = arith.constant 0 : index
      %28 = vector.load %arg7[%c0_17, %c0_18] : memref<8x1xf32, #tpu.memory_space<vmem>>, vector<8x1xf32>
      %29 = tpu.reciprocal %28 : vector<8x1xf32> -> vector<8x1xf32>
      %30 = arith.mulf %28, %29 : vector<8x1xf32>
      %c0_19 = arith.constant 0 : index
      %c0_20 = arith.constant 0 : index
      %31 = vector.load %arg2[%c0_19, %c0_20] : memref<8x128xf32, #tpu.memory_space<vmem>>, vector<8x128xf32>
      %32 = vector.broadcast %30 : vector<8x1xf32> to vector<8x128xf32>
      %33 = arith.mulf %31, %32 : vector<8x128xf32>
      %c0_21 = arith.constant 0 : index
      %c0_22 = arith.constant 0 : index
      %34 = vector.load %arg5[%c0_21, %c0_22] : memref<8x128xf32, #tpu.memory_space<vmem>>, vector<8x128xf32>
      tpu.vector_store %arg5[%c0_21, %c0_22], %33 {strides = array<i32>} : memref<8x128xf32, #tpu.memory_space<vmem>>, vector<8x128xf32>,
    } else {
    }
    return
  }
  func.func @transform_0(%arg0: i32, %arg1: i32) -> (i32, i32) {
    %c0_i32 = arith.constant 0 : i32
    %c0_i32_0 = arith.constant 0 : i32
    return %arg0, %c0_i32 : i32, i32
  }
  func.func @transform_1(%arg0: i32, %arg1: i32) -> (i32, i32) {
    %c0_i32 = arith.constant 0 : i32
    %c0_i32_0 = arith.constant 0 : i32
    return %arg0, %c0_i32 : i32, i32
  }
  func.func @transform_2(%arg0: i32, %arg1: i32) -> (i32, i32, i32) {
    %c0_i32 = arith.constant 0 : i32
    %c0_i32_0 = arith.constant 0 : i32
    return %arg0, %arg1, %c0_i32 : i32, i32, i32
  }
  func.func @transform_3(%arg0: i32, %arg1: i32) -> (i32, i32) {
    %c0_i32 = arith.constant 0 : i32
    %c0_i32_0 = arith.constant 0 : i32
    return %arg0, %c0_i32 : i32, i32
  }
}

</mosaic_0001>

<bundles_post_ra>
// kernel: tpu_custom_call.1
= control target key start
LH: loop header
LB: loop body
LE: loop exit
PB: predicated region body
PF: predicated region fallthrough
CT: control target
= control target key end

     0   :  { %s1385_s0 = inlined_call_operand.hbm [shape: f32[16,128], index: 0, kind: input, shape index: {}]   ;;  %s1386_s1 = inlined_call_operand.hbm [shape: f32[16,128], index: 1, kind: input, shape index: {}]   ;;  %s1387_s2 = inlined_call_operand.hbm [shape: f32[16,8,128], index: 2, kind: input, shape index: {}]   ;;  %s1388_s3 = inlined_call_operand.hbm [shape: f32[16,128], index: 3, kind: output, shape index: {}]  }
   0x1   :  { %1391 = sst [smem:[#allocation17_spill]] %s1386_s1 }
   0x2   :  { %8 = vsyncpa [#allocation5], 0 }
   0x3   :  { %10 = vsyncpa [#allocation5 + $0x1], 0 }
   0x4   :  { %11 = vsyncpa [#allocation8], 0 }
   0x5   :  { %13 = vsyncpa [#allocation8 + $0x1], 0 }
   0x6   :  { %14 = vsyncpa [#allocation6], 0 }
   0x7   :  { %16 = vsyncpa [#allocation6 + $0x1], 0  ;;  %s1094_s12 = smov 0   ;;  %s1096_s13 = smov 0  }
   0x8   :  { %s1098_s14 = smov 0   ;;  %s1100_s15 = smov 0  }
   0x9   :  { %s1102_s16 = smov 0   ;;  %s1104_s17 = smov 0  }
   0xa LB: > { %1392 = sst [smem:[#allocation14_spill]] %s1050_s14  ;;  %s1125_s18 = sadd.s32 4294967295, %s1062_s17   ;;  %s1062_s17 = sphi %s1104_s17, %s22_s17   ;;  %s1058_s16 = sphi %s1102_s16, %s1409_s16   ;;  %s1054_s15 = sphi %s1100_s15, %s1408_s15   ;;  %s1050_s14 = sphi %s1098_s14, %s1404_s14   ;;  %s1046_s13 = sphi %s1096_s13, %s1407_s13   ;;  %s1042_s12 = sphi %s1094_s12, %s1406_s12  }
   0xb   : > { %s773_s19 = sadd.s32 4294967294, %s1062_s17   ;;  %s34_s20 = sadd.s32 1, %s1058_s16 }
   0xc   : > { %s41_s21 = sadd.s32 1, %s1050_s14  ;;  %p36_p0 = scmp.ge.s32.totalorder %s34_s20, 2 }
   0xd   : > { %p48_p1 = scmp.ne.s32.totalorder %s1050_s14, %s1046_s13  ;;  %p49_p2 = scmp.eq.s32.totalorder %s1062_s17, 0 }
   0xe   : > { %p54_p3 = scmp.ne.s32.totalorder %s1046_s13, %s1042_s12  ;;  %s1411_s20 = smov (%p36_p0, %s34_s20), 0 }
   0xf   : > { %1393 = sst [smem:[#allocation15_spill]] %s1411_s20  ;;  %p1137_p4 = por %p49_p2, %p48_p1 }
  0x10   : > { %p55_p5 = scmp.eq.s32.totalorder %s1125_s18, 0  ;;  %s38_s23 = ssub.s32 %s1058_s16, %s1411_s20 }
  0x11   : > { %p132_p6 = scmp.eq.s32.totalorder %s1125_s18, 1  ;;  %p39_p7 = scmp.eq.s32.totalorder %s38_s23, 0 }
  0x12   : > { %p1145_p8 = por %p55_p5, %p54_p3  ;;  %p138_p10 = scmp.eq.s32.totalorder %s773_s19, 1 }
  0x13   : > { %p1149_p9 = por %p132_p6, %p48_p1  ;;  %p815_p13 = scmp.lt.s32.totalorder %s1062_s17, 2 }
  0x14   : > { %s1154_s26 = scalar_select %p39_p7, %s1050_s14, %s41_s21  }
  0x15   : > { %p1156_p11 = por %p138_p10, %p54_p3  ;;  %s1163_s28 = sand.u32 1, %s1050_s14  }
  0x16   : > { %1397 = sst [smem:[#allocation16_spill]] %s1154_s26  ;;  %s776_s29 = sshll.u32 %s1163_s28, 3 }
  0x17   : > { %s777_s30 = sshll.u32 %s1058_s16, 7  ;;  %p1169_p0 = pnand %p815_p13, %p1137_p4 }
  0x18   : > { %s176_s5 = sand.u32 1, %s1062_s17   ;;  %s1400_s1 = sld [smem:[#allocation17_spill]] }
  0x19   : > { %s180_s9 = scalar_lea.vmem [#allocation7], %s776_s29  ;;  %s780_s11 = sshll.u32 %s1163_s28, 6 }
  0x1a   : > { %s187_s10 = sshll.u32 %s180_s9, 4  ;;  %s1182_s19 = scalar_lea.sflag [#allocation8], %s176_s5  ;;  %s188_s10 = int_to_ptr.vmem [resolvable:$true] %s187_s10 }
  0x1b   : > { %p896_p1 = pneg %p1169_p0  ;;  %s907_s21 = scalar_lea.vmem %s188_s10, 128 }
  0x1c   : > { %p908_p2 = scmp.ne.s32.totalorder %s188_s10, %s907_s21  ;;  %s1064_s22 = smov [#allocation7]  }
  0x1d   : > { %s912_s23 = sshll.u32 %s1064_s22, 4  ;;  %s913_s23 = int_to_ptr.vmem [resolvable:$false] %s912_s23 }
  0x1e   : > { %s185_s8 = scalar_lea.hbm %s1400_s1, %s777_s30  ;;  %p910_p3 = pnand %p908_p2, %p896_p1 }
  0x1f   : > { %s914_s6 = scalar_lea.vmem %s913_s23, 256  ;;  %p915_p5 = scmp.lt.s32.totalorder %s188_s10, %s913_s23 }
  0x20   : > { %p911_p4 = pneg %p910_p3  ;;  %p916_p6 = scmp.lt.s32.totalorder %s914_s6, %s907_s21 }
  0x22   : > { %p917_p7 = por %p916_p6, %p915_p5 }
  0x24   : > { %p918_p10 = pnand %p917_p7, %p911_p4 }
  0x26   : > { %921 = shalt.err (!%p918_p10)
}
  0x27   : > { %807 = dma.hbm_to_vmem [thread:$0]  (!%p1169_p0), %s185_s8, 128, %s188_s10, %s1182_s19  }
  0x28   : > { %s198_s5 = scalar_lea.vmem [#allocation9], %s780_s11  ;;  %p783_p13 = scmp.ge.s32.totalorder %s1062_s17, 1 }
  0x29   : > { %s206_s7 = sshll.u32 %s198_s5, 4  ;;  %p214_p2 = scmp.lt.s32.totalorder %s1062_s17, 3  ;;  %s1193_s7 = int_to_ptr.vmem [resolvable:$true] %s206_s7 }
  0x2a   : > { %s167_s23 = scalar_lea.hbm %s1385_s0, %s777_s30  ;;  %s162_s6 = scalar_lea.vmem [#allocation4], %s776_s29 }
  0x2b   : > { %p1196_p3 = pnand %p783_p13, %p214_p2  ;;  %s169_s1 = sshll.u32 %s162_s6, 4  ;;  %s170_s1 = int_to_ptr.vmem [resolvable:$true] %s169_s1 }
  0x2c   : > { %s792_s8 = sshll.u32 %s1058_s16, 10  ;;  %s159_s20 = scalar_lea.sflag [#allocation5], %s1163_s28 }
  0x2d   : > { %s1211_s5 = scalar_lea.hbm %s1387_s2, %s792_s8  ;;  %s935_s26 = scalar_lea.vmem %s170_s1, 128 }
  0x2e   : > { %p936_p4 = scmp.ne.s32.totalorder %s170_s1, %s935_s26  ;;  %s1065_s14 = smov [#allocation4]  }
  0x2f   : > { %s940_s21 = sshll.u32 %s1065_s14, 4  ;;  %s941_s21 = int_to_ptr.vmem [resolvable:$false] %s940_s21 }
  0x30   : > { %p938_p5 = pnand %p936_p4, %p896_p1  ;;  %s942_s30 = scalar_lea.vmem %s941_s21, 256 }
  0x31   : > { %p943_p7 = scmp.lt.s32.totalorder %s170_s1, %s941_s21  ;;  %p944_p10 = scmp.lt.s32.totalorder %s942_s30, %s935_s26 }
  0x32   : > { %p939_p6 = pneg %p938_p5 }
  0x33   : > { %p945_p13 = por %p944_p10, %p943_p7 }
  0x35   : > { %p946_p2 = pnand %p945_p13, %p939_p6 }
  0x37   : > { %949 = shalt.err (!%p946_p2)
}
  0x38   : > { %804 = dma.hbm_to_vmem [thread:$0]  (!%p1169_p0), %s167_s23, 128, %s170_s1, %s159_s20  }
  0x39   : > { %s963_s28 = scalar_lea.vmem %s1193_s7, 1024  ;;  %s1066_s14 = smov [#allocation9]  }
  0x3a   : > { %p964_p12 = scmp.ne.s32.totalorder %s1193_s7, %s963_s28  ;;  %s968_s29 = sshll.u32 %s1066_s14, 4  ;;  %s969_s29 = int_to_ptr.vmem [resolvable:$false] %s968_s29 }
  0x3b   : > { %s970_s26 = scalar_lea.vmem %s969_s29, 2048  ;;  %p971_p7 = scmp.lt.s32.totalorder %s1193_s7, %s969_s29 }
  0x3c   : > { %p966_p4 = pnand %p964_p12, %p896_p1  ;;  %p972_p6 = scmp.lt.s32.totalorder %s970_s26, %s963_s28 }
  0x3e   : > { %p967_p5 = pneg %p966_p4  ;;  %p973_p10 = por %p972_p6, %p971_p7 }
  0x40   : > { %p974_p13 = pnand %p973_p10, %p967_p5 }
  0x42   : > { %977 = shalt.err (!%p974_p13)
}
  0x43   : > { %s1067_s22 = smov 128   ;;  %s1068_s1 = smov 8  }
  0x44   : > { %810 = dma.hbm_to_vmem [thread:$0]  (!%p1169_p0), %s1211_s5, 1024, %s1193_s7, %s1182_s19, %s1067_s22, %s1067_s22, %s1068_s1  }
  0x45   : > { %218 = sbr.rel (%p1196_p3) target bundleno = 989 (0x3dd), region = 32  ;;  %s1233_s20 = sand.u32 (!%p1196_p3), 1, %s1046_s13  }
  0x46   : > { %s1236_s23 = sshll.u32 (!%p1196_p3), %s1233_s20, 3  ;;  %s221_s6 = scalar_lea.sflag (!%p1196_p3), [#allocation5], %s1233_s20 }
  0x47   : > { %s224_s8 = scalar_lea.vmem (!%p1196_p3), [#allocation4], %s1236_s23 }
  0x4a   : > { %1029 = dma.done.wait (%p1145_p8), %s221_s6, 128  }
  0x4b   : > { %1031 = vsyncadd (%p1145_p8), %s221_s6, 4294967168  ;;  %s229_s4 = sand.u32 1, %s1125_s18   ;;  %s233_s7 = scalar_lea.vmem [#allocation7], %s1236_s23 }
  0x4c   : > { %s230_s19 = scalar_lea.sflag [#allocation8], %s229_s4 }
  0x4d   : > { %1033 = dma.done.wait (%p1145_p8), %s230_s19, 1152  }
  0x4e   : > { %1035 = vsyncadd (%p1145_p8), %s230_s19, 4294966144  ;;  %v297_v0 = vlaneseq  ;;  %v1069_v1 = vmov 1966171168   ;;  %s786_s9 = sshll.u32 %s1233_s20, 6  ;;  %v283_v6 = vld [vmem:[%s233_s7] sm:$0xff]  ;;  %vm280_vm0 = vcmask 7168  }
  0x4f   : > { %v295_v2 = vunpack.c.l.s4 %v1069_v1  ;;  %v293_v9 = vcombine.high %v283_v6, %v283_v6  ;;  %s1257_s18 = scalar_lea.vmem [#allocation9], %s786_s9  ;;  %v1070_v45 = vmov -inf   ;;  %vm449_vm1 = vcmask 1041409   ;;  %s789_s24 = sshll.u32 %s1054_s15, 7 }
  0x50   : > { %v1250_v3 = vshrl.u32 %v297_v0, 7  ;;  %v284_v13 = vld [vmem:[%s1257_s18] sm:$0xff]  ;;  %v286_v18 = vld [vmem:[%s1257_s18 + $0x10] sm:$0xff]  ;;  %v285_v19 = vld [vmem:[%s1257_s18 + $0x8] sm:$0xff]  ;;  %281 = vst.msk [vmem:[#allocation2] sm:$0xff] %vm280_vm0, %v1070_v45  ;;  %v416_v46 = vand.u32 127, %v297_v0  ;;  %s647_s30 = scalar_lea.hbm %s1388_s3, %s789_s24 }
  0x51   : > { %v296_v4 = vunpack.c.0.s8 %v295_v2  ;;  %v287_v25 = vld [vmem:[%s1257_s18 + $0x18] sm:$0xff]  ;;  %v288_v32 = vld [vmem:[%s1257_s18 + $0x20] sm:$0xff]  ;;  %v289_v36 = vld [vmem:[%s1257_s18 + $0x28] sm:$0xff]  ;;  %vm451_vm2 = vcmask 1042434   ;;  %vm453_vm3 = vcmask 1043459   ;;  %vm455_vm4 = vcmask 1044484  }
  0x52   : > { %v1255_v8 = vsub.s32 0, %v1250_v3  ;;  %v290_v39 = vld [vmem:[%s1257_s18 + $0x30] sm:$0xff]  ;;  %v291_v42 = vld [vmem:[%s1257_s18 + $0x38] sm:$0xff]  ;;  %v1277_v48 = vsub.s32 %v416_v46, %v1250_v3  ;;  %vm457_vm5 = vcmask 1045509   ;;  %vm459_vm6 = vcmask 1046534   ;;  %s274_s10 = scalar_lea.vmem [#allocation10], %s1236_s23 }
  0x53   : > { %v299_v5 = vsub.s32 %v296_v4, %v1250_v3  ;;  %vm461_vm7 = vcmask 1047559   ;;  %vm464_vm8 = vcmask 64512   ;;  %s649_s11 = sshll.u32 %s274_s10, 4  ;;  %s636_s28 = scalar_lea.sflag [#allocation6], %s1233_s20  ;;  %s650_s11 = int_to_ptr.vmem [resolvable:$true] %s649_s11 }
  0x54   : > { %s978_s14 = scalar_lea.vmem %s650_s11, 128  ;;  %s1073_s29 = smov [#allocation10]  }
  0x55   : > { %v300_v7 = vrot.slane %v283_v6, %v299_v5  ;;  %v307_v12 = vrot.slane %v293_v9, %v299_v5  ;;  %p979_p8 = scmp.ne.s32.totalorder %s650_s11, %s978_s14  ;;  %s982_s26 = sshll.u32 %s1073_s29, 4  ;;  %s983_s26 = int_to_ptr.vmem [resolvable:$false] %s982_s26 }
  0x56   : > { %s984_s15 = scalar_lea.vmem %s983_s26, 256  ;;  %p985_p1 = scmp.lt.s32.totalorder %s650_s11, %s983_s26 }
  0x57   : > { %v316_v10 = vrot.slane %v300_v7, %v299_v5  ;;  %v308_v11 = vcombine.high %v300_v7, %v300_v7  ;;  %v323_v17 = vrot.slane %v307_v12, %v299_v5  ;;  %v309_v20 = vcombine.high %v307_v12, %v307_v12  ;;  %v1302_v12 = vld [vmem:[#allocation2] sm:$0xff]  ;;  %p980_p12 = pnand %p979_p8, %p1149_p9  ;;  %p986_p3 = scmp.lt.s32.totalorder %s984_s15, %s978_s14 }
  0x59   : > { %v345_v14 = vrot.slane %v316_v10, %v1255_v8  ;;  %v338_v15 = vcombine.high %v316_v10, %v316_v10  ;;  %v330_v16 = vrot.slane %v308_v11, %v299_v5  ;;  %v361_v26 = vrot.slane %v323_v17, %v1255_v8  ;;  %p981_p0 = pneg %p980_p12  ;;  %p987_p2 = por %p986_p3, %p985_p1 }
  0x5a   : > { %v337_v27 = vrot.slane %v309_v20, %v299_v5  ;;  %v339_v31 = vcombine.high %v323_v17, %v323_v17  ;;  %v1071_v10 = vmov 0   ;;  %v1072_v11 = vmov 0.0  }
  0x5b   : > { %v382_v21 = vmul.f32 %v345_v14, %v284_v13  ;;  %v353_v22 = vrot.slane %v338_v15, %v1255_v8  ;;  %v349_v23 = vrot.slane %v330_v16, %v1255_v8  ;;  %v340_v24 = vcombine.high %v330_v16, %v330_v16  ;;  %871 = vset.pattern.permute.xlu1 %v1071_v10  ;;  %p988_p4 = pnand %p987_p2, %p981_p0 }
  0x5c   : > { %v365_v34 = vrot.slane %v337_v27, %v1255_v8  ;;  %v341_v35 = vcombine.high %v337_v27, %v337_v27  ;;  %v386_v37 = vmul.f32 %v361_v26, %v288_v32  ;;  %v369_v38 = vrot.slane %v339_v31, %v1255_v8  ;;  %872 = vset.pattern.permute.xlu0 %v1071_v10 }
  0x5d   : > { %390 = vadd.xlane.f32.xlu0 %v382_v21  ;;  %v384_v28 = vmul.f32 %v353_v22, %v286_v18  ;;  %v383_v29 = vmul.f32 %v349_v23, %v285_v19  ;;  %v357_v30 = vrot.slane %v340_v24, %v1255_v8  ;;  %282 = vst.msk [vmem:[#allocation3] sm:$0xff] %vm280_vm0, %v1072_v11  ;;  %v484_v16 = vsub.s32 1, %v1250_v3 }
  0x5e   : > { %v387_v40 = vmul.f32 %v365_v34, %v289_v36  ;;  %v373_v41 = vrot.slane %v341_v35, %v1255_v8  ;;  %v388_v43 = vmul.f32 %v369_v38, %v290_v39  ;;  %v488_v17 = vsub.s32 2, %v1250_v3 }
  0x5f   : > { %394 = vadd.xlane.f32.xlu1 %v384_v28  ;;  %v385_v33 = vmul.f32 %v357_v30, %v287_v25  ;;  %v492_v18 = vsub.s32 3, %v1250_v3  ;;  %v496_v25 = vsub.s32 4, %v1250_v3  ;;  %v500_v30 = vsub.s32 5, %v1250_v3 }
  0x60   : > { %v389_v44 = vmul.f32 %v373_v41, %v291_v42  ;;  %v504_v34 = vsub.s32 6, %v1250_v3 }
  0x61   : > { %392 = vadd.xlane.f32.xlu0 %v383_v29 }
  0x63   : > { %396 = vadd.xlane.f32.xlu1 %v385_v33 }
  0x65   : > { %398 = vadd.xlane.f32.xlu0 %v386_v37  ;;  %v508_v37 = vsub.s32 7, %v1250_v3 }
  0x67   : > { %400 = vadd.xlane.f32.xlu1 %v387_v40 }
  0x69   : > { %402 = vadd.xlane.f32.xlu0 %v388_v43 }
  0x6b   : > { %404 = vadd.xlane.f32.xlu1 %v389_v44 }
  0xe6   : > { %v391_v47 = vpop.xlane.xlu0 %390 }
  0xe7   : > { %v420_v51 = vrot.slane %v391_v47, %v1277_v48 }
  0xe8   : > { %v395_v49 = vpop.xlane.xlu1 %394 }
  0xe9   : > { %v428_v53 = vrot.slane %v395_v49, %v1277_v48 }
  0xea   : > { %v393_v50 = vpop.xlane.xlu0 %392 }
  0xeb   : > { %v424_v52 = vrot.slane %v393_v50, %v1277_v48 }
  0xec   : > { %v397_v54 = vpop.xlane.xlu1 %396 }
  0xed   : > { %v450_v55 = vsel %vm449_vm1, %v424_v52, %v420_v51  ;;  %v432_v56 = vrot.slane %v397_v54, %v1277_v48 }
  0xee   : > { %v452_v57 = vsel %vm451_vm2, %v428_v53, %v450_v55  ;;  %v399_v58 = vpop.xlane.xlu0 %398 }
  0xef   : > { %v454_v59 = vsel %vm453_vm3, %v432_v56, %v452_v57  ;;  %v436_v60 = vrot.slane %v399_v58, %v1277_v48 }
  0xf0   : > { %v401_v61 = vpop.xlane.xlu1 %400 }
  0xf1   : > { %v456_v62 = vsel %vm455_vm4, %v436_v60, %v454_v59  ;;  %v440_v63 = vrot.slane %v401_v61, %v1277_v48 }
  0xf2   : > { %v1289_v0 = vpop.xlane.xlu0 %402 }
  0xf3   : > { %v444_v1 = vrot.slane %v1289_v0, %v1277_v48  ;;  %v458_v2 = vsel %vm457_vm5, %v440_v63, %v456_v62 }
  0xf4   : > { %v1294_v4 = vpop.xlane.xlu1 %404 }
  0xf5   : > { %v448_v5 = vrot.slane %v1294_v4, %v1277_v48  ;;  %v460_v6 = vsel %vm459_vm6, %v444_v1, %v458_v2 }
  0xf7   : > { %v462_v7 = vsel %vm461_vm7, %v448_v5, %v460_v6 }
  0xf8   : > { %v465_v9 = vsel %vm464_vm8, %v462_v7, -inf }
  0xf9   : > { %466 = vmax.xlane.f32.xlu0 %v465_v9 }
 0x182   : > { %v467_v13 = vpop.xlane.xlu0 %466 }
 0x183   : > { %v1305_v14 = vmax.f32 %v1302_v12, %v467_v13 }
 0x185   : > { %v469_v15 = vsub.f32 %v1302_v12, %v1305_v14  ;;  %620 = vst.msk [vmem:[#allocation2] sm:$0xff] %vm280_vm0, %v1305_v14  ;;  %476 = vperm.xlu1 %871, %v1305_v14  }
 0x200   : > { %v477_v19 = vpop.permute.xlu1 %476 }
 0x201   : > { %v481_v20 = vrot.slane %v477_v19, %v1255_v8  ;;  %v485_v21 = vrot.slane %v477_v19, %v484_v16  ;;  %v489_v22 = vrot.slane %v477_v19, %v488_v17  ;;  %v493_v26 = vrot.slane %v477_v19, %v492_v18 }
 0x202   : > { %v497_v31 = vrot.slane %v477_v19, %v496_v25  ;;  %v501_v8 = vrot.slane %v477_v19, %v500_v30  ;;  %v505_v38 = vrot.slane %v477_v19, %v504_v34  ;;  %v509_v42 = vrot.slane %v477_v19, %v508_v37 }
 0x203   : > { %v518_v23 = vsub.f32 %v391_v47, %v481_v20  ;;  %v519_v24 = vsub.f32 %v393_v50, %v485_v21  ;;  %v520_v27 = vsub.f32 %v395_v49, %v489_v22  ;;  %v521_v32 = vsub.f32 %v397_v54, %v493_v26  ;;  %v472_v22 = vld [vmem:[#allocation3] sm:$0xff] }
 0x204   : > { %v522_v35 = vsub.f32 %v399_v58, %v497_v31  ;;  %v523_v39 = vsub.f32 %v401_v61, %v501_v8  ;;  %v524_v43 = vsub.f32 %v1289_v0, %v505_v38  ;;  %v525_v46 = vsub.f32 %v1294_v4, %v509_v42 }
 0x205   : > { %v526_v28 = vmul.f32 1.442695, %v518_v23  ;;  %v528_v29 = vmul.f32 1.442695, %v519_v24  ;;  %v530_v33 = vmul.f32 1.442695, %v520_v27 }
 0x206   : > { %v532_v36 = vmul.f32 1.442695, %v521_v32  ;;  %v534_v40 = vmul.f32 1.442695, %v522_v35  ;;  %v536_v44 = vmul.f32 1.442695, %v523_v39 }
 0x207   : > { %874 = vpow2.f32 %v526_v28  ;;  %v538_v47 = vmul.f32 1.442695, %v524_v43  ;;  %v540_v3 = vmul.f32 1.442695, %v525_v46  ;;  %v470_v20 = vmul.f32 1.442695, %v469_v15 }
 0x208   : > { %876 = vpow2.f32 %v528_v29  ;;  %v627_v28 = vld [vmem:[%s224_s8] sm:$0xff] }
 0x209   : > { %878 = vpow2.f32 %v530_v33 }
 0x20a   : > { %880 = vpow2.f32 %v532_v36 }
 0x20b   : > { %882 = vpow2.f32 %v534_v40 }
 0x20c   : > { %884 = vpow2.f32 %v536_v44 }
 0x20d   : > { %886 = vpow2.f32 %v538_v47 }
 0x20e   : > { %888 = vpow2.f32 %v540_v3 }
 0x20f   : > { %890 = vpow2.f32 %v470_v20 }
 0x214   : > { %v875_v41 = vpop.eup %874 }
 0x215   : > { %v877_v45 = vpop.eup %876  ;;  %551 = vperm.xlu0 %872, %v875_v41  }
 0x216   : > { %554 = vperm.xlu1 %871, %v877_v45   ;;  %v879_v49 = vpop.eup %878 }
 0x217   : > { %v881_v50 = vpop.eup %880 }
 0x218   : > { %v883_v51 = vpop.eup %882 }
 0x219   : > { %v885_v52 = vpop.eup %884 }
 0x21a   : > { %557 = vperm.xlu1 %871, %v879_v49   ;;  %v887_v53 = vpop.eup %886 }
 0x21b   : > { %v889_v54 = vpop.eup %888 }
 0x21c   : > { %v891_v21 = vpop.eup %890 }
 0x21d   : > { %v473_v23 = vmul.f32 %v891_v21, %v472_v22 }
 0x21e   : > { %560 = vperm.xlu1 %871, %v881_v50  }
 0x222   : > { %563 = vperm.xlu1 %871, %v883_v51  }
 0x226   : > { %566 = vperm.xlu1 %871, %v885_v52  }
 0x22a   : > { %569 = vperm.xlu1 %871, %v887_v53  }
 0x22e   : > { %572 = vperm.xlu1 %871, %v889_v54  }
 0x290   : > { %v552_v59 = vpop.permute.xlu0 %551 }
 0x291   : > { %v555_v55 = vpop.permute.xlu1 %554  ;;  %v577_v62 = vrot.slane %v552_v59, %v1277_v48 }
 0x292   : > { %v581_v61 = vrot.slane %v555_v55, %v1277_v48 }
 0x294   : > { %v606_v4 = vsel %vm449_vm1, %v581_v61, %v577_v62 }
 0x295   : > { %v558_v56 = vpop.permute.xlu1 %557 }
 0x296   : > { %v585_v63 = vrot.slane %v558_v56, %v1277_v48 }
 0x298   : > { %v607_v6 = vsel %vm451_vm2, %v585_v63, %v606_v4 }
 0x299   : > { %v561_v57 = vpop.permute.xlu1 %560 }
 0x29a   : > { %v589_v0 = vrot.slane %v561_v57, %v1277_v48 }
 0x29c   : > { %v608_v9 = vsel %vm453_vm3, %v589_v0, %v607_v6 }
 0x29d   : > { %v564_v58 = vpop.permute.xlu1 %563 }
 0x29e   : > { %v593_v1 = vrot.slane %v564_v58, %v1277_v48 }
 0x2a0   : > { %v609_v10 = vsel %vm455_vm4, %v593_v1, %v608_v9 }
 0x2a1   : > { %v567_v60 = vpop.permute.xlu1 %566 }
 0x2a2   : > { %v597_v5 = vrot.slane %v567_v60, %v1277_v48 }
 0x2a4   : > { %v610_v13 = vsel %vm457_vm5, %v597_v5, %v609_v10 }
 0x2a5   : > { %v570_v2 = vpop.permute.xlu1 %569 }
 0x2a6   : > { %v601_v7 = vrot.slane %v570_v2, %v1277_v48 }
 0x2a8   : > { %v611_v17 = vsel %vm459_vm6, %v601_v7, %v610_v13 }
 0x2a9   : > { %v573_v11 = vpop.permute.xlu1 %572 }
 0x2aa   : > { %v605_v16 = vrot.slane %v573_v11, %v1277_v48 }
 0x2ac   : > { %v612_v18 = vsel %vm461_vm7, %v605_v16, %v611_v17 }
 0x2ad   : > { %v614_v19 = vsel %vm464_vm8, %v612_v18, 0.0 }
 0x2ae   : > { %615 = vadd.xlane.f32.xlu1 %v614_v19 }
 0x337   : > { %v616_v24 = vpop.xlane.xlu1 %615 }
 0x338   : > { %v617_v48 = vadd.f32 %v616_v24, %v473_v23 }
 0x33a   : > { %619 = vst.msk [vmem:[#allocation3] sm:$0xff] %vm280_vm0, %v617_v48 }
 0x341   : > { %v624_v25 = vld [vmem:[#allocation3] sm:$0xff] }
 0x342   : > { %892 = vrcp.f32 %v624_v25 }
 0x34f   : > { %v893_v26 = vpop.eup %892 }
 0x350   : > { %v626_v27 = vmul.f32 %v893_v26, %v624_v25 }
 0x352   : > { %630 = vperm.xlu0 %872, %v626_v27  }
 0x3cd   : > { %v631_v12 = vpop.permute.xlu0 %630 }
 0x3ce   : > { %v633_v14 = vmul.f32 %v631_v12, %v627_v28 }
 0x3d0   : > { %634 = vst [vmem:[%s274_s10] sm:$0xff] %v633_v14 }
 0x3d1   : > { %991 = shalt.err (!%p988_p4)
}
 0x3d2   : > { %s992_s22 = scalar_lea.hbm %s647_s30, 128  ;;  %s996_s23 = scalar_lea.hbm %s1388_s3, 256 }
 0x3d3   : > { %p993_p5 = scmp.ne.s32.totalorder %s647_s30, %s992_s22  ;;  %p997_p10 = scmp.lt.s32.totalorder %s647_s30, %s1388_s3 }
 0x3d4   : > { %p998_p13 = scmp.lt.s32.totalorder %s996_s23, %s992_s22 }
 0x3d5   : > { %p994_p7 = pnand %p993_p5, %p1149_p9 }
 0x3d6   : > { %p999_p8 = por %p998_p13, %p997_p10 }
 0x3d7   : > { %p995_p6 = pneg %p994_p7 }
 0x3d9   : > { %p1000_p12 = pnand %p999_p8, %p995_p6 }
 0x3db   : > { %1003 = shalt.err (!%p1000_p12)
}
 0x3dc   : > { %799 = dma.vmem_to_hbm [thread:$0]  (%p1149_p9), %s650_s11, 128, %s647_s30, %s636_s28  }
 0x3dd PF: > { %s661_s4 = sand.u32 1, %s1042_s12   ;;  %p1402_p0 = scmp.ge.s32.totalorder %s1062_s17, 2 }
 0x3de   : > { %s662_s19 = scalar_lea.sflag [#allocation6], %s661_s4 }
 0x3df   : > { %p812_p1 = pnand %p1402_p0, %p1156_p11 }
 0x3e1   : > { %p813_p3 = pneg %p812_p1 }
 0x3e3   : > { %1037 = dma.done.wait (%p813_p3), %s662_s19, 128  }
 0x3e4   : > { %1039 = vsyncadd (%p813_p3), %s662_s19, 4294967168  ;;  %s22_s17 = sadd.s32 1, %s1062_s17   ;;  %s1403_s7 = sld [smem:[#allocation14_spill]] }
 0x3e5   : > { %p19_p2 = scmp.ge.s32.totalorder %s22_s17, 4   ;;  %s1404_s14 = sld [smem:[#allocation16_spill]] }
 0x3e6   : > { %s1405_s25 = sld [smem:[#allocation15_spill]]  ;;  %s1406_s12 = smov %s1046_s13 }
 0x3e7   : > { %s1408_s15 = smov %s1058_s16 }
 0x3e8   :  { %21 = sbr.rel (!%p19_p2) target bundleno = 10 (0xa), region = 109 }
 0x3ea   : > { %s1407_s13 = smov %s1403_s7 }
 0x3ec   : > { %s1409_s16 = smov %s1405_s25 }
 0x3ed   :  { %667 = vsyncpa [#allocation5], 1 }
 0x3ee   :  { %669 = vsyncpa [#allocation5 + $0x1], 1 }
 0x3ef   :  { %670 = vsyncpa [#allocation8], 1 }
 0x3f0   :  { %672 = vsyncpa [#allocation8 + $0x1], 1 }
 0x3f1   :  { %673 = vsyncpa [#allocation6], 1 }
 0x3f2   :  { %675 = vsyncpa [#allocation6 + $0x1], 1 }

</bundles_post_ra>
